<compile_context>
chip_gen: v7x
topology: tpu7x:2x2x1
jax: 0.10.0
libtpu: 0.0.40
codegen_flags: <defaults>
</compile_context>

<pallas_src>
import jax
import jax.numpy as jnp
from jax.experimental import pallas as pl
from jax.experimental.pallas import tpu as pltpu


def _round_up(x, m):
    return ((x + m - 1) // m) * m


def _cdiv(a, b):
    return -(-a // b)


def _vmem_budget():
    """Generation-aware scoped-VMEM limit (bytes)."""
    try:
        cap = int(pltpu.get_tpu_info().vmem_capacity_bytes)
    except Exception:
        cap = 64 << 20  # conservative default: v7x per-TensorCore VMEM
    if cap >= (96 << 20):               # v4/v5e/v6e class (128 MiB physical)
        return 100 << 20
    # v7x class (64 MiB physical): leave headroom for compiler scratch.
    return max(min(cap - (16 << 20), 48 << 20), 24 << 20)


def _select_tiling(rows, dim_p, in_bytes):
    """Pick (tile_rows, vmem_limit_bytes) for the row-tiled grid."""
    rows8 = _round_up(max(rows, 1), 8)
    limit = _vmem_budget()
    headroom = 4 << 20
    # Resident (single-buffered) weights + small bias / w3 vectors.
    weights = 2 * dim_p * dim_p * in_bytes + 3 * dim_p * in_bytes
    budget = limit - headroom - weights
    if budget <= 0:
        # TODO(synk): K-tiled weight-streaming path for very large dim.
        raise ValueError(
            f"dim_p={dim_p}: resident weights ({weights / 2**20:.1f} MiB) do "
            f"not fit the VMEM budget ({limit / 2**20:.1f} MiB); use "
            "compute_dtype=jnp.bfloat16 or a K-tiled variant.")
    # Per-row VMEM: 2x x-tile buffers + ~2 f32 (TILE_R, dim_p) intermediates
    # + 2x f32 output lanes.
    per_row = 2 * dim_p * in_bytes + 2 * dim_p * 4 + 2 * 4
    tile = budget // per_row
    tile = min(tile, 1024)                  # diminishing returns past this
    if tile >= 256:
        tile = (tile // 256) * 256          # keep the 256-wide MXU fed
    else:
        tile = max((tile // 8) * 8, 8)
    tile = min(tile, rows8)
    # Megacore: prefer >= 2 row tiles so v7x's second TensorCore gets work.
    if rows8 > 8 and _cdiv(rows8, tile) < 2:
        tile = _round_up(_cdiv(rows8, 2), 8)
    # Prefer a tile that divides rows exactly -> no row-padding copy of x.
    if rows % tile != 0:
        for cand in range(tile, max(tile // 2, 8) - 1, -8):
            if rows % cand == 0:
                tile = cand
                break
    return int(tile), int(limit)


def prepare_params(params, *, compute_dtype=jnp.float32):
    """One-time weight prep: transpose, cast, pad dim to a multiple of 128.

    Hoisted out of the per-call wrapper so a discriminator called every step
    with fixed weights does not pay an XLA transpose/pad per call.
    """
    dim = params["w1"].shape[0]
    dim_p = _round_up(dim, 128)
    pad = dim_p - dim

    def pad_mat(m):
        m = m.astype(jnp.float32)
        return jnp.pad(m, ((0, pad), (0, pad))) if pad else m

    def pad_vec(v):
        v = v.reshape(-1).astype(jnp.float32)
        return (jnp.pad(v, (0, pad)) if pad else v).reshape(1, dim_p)

    return {
        "dim": dim,
        "dim_p": dim_p,
        "compute_dtype": jnp.dtype(compute_dtype),
        "w1t": pad_mat(params["w1"]).T.astype(compute_dtype),   # (dim_p,dim_p)
        "b1": pad_vec(params["b1"]),                            # f32
        "w2t": pad_mat(params["w2"]).T.astype(compute_dtype),   # (dim_p,dim_p)
        "b2": pad_vec(params["b2"]),                            # f32
        "w3": pad_vec(params["w3"]),                            # f32 (VPU tail)
        "b3": params["b3"].reshape(1).astype(jnp.float32),      # SMEM scalar
    }


def _disc_kernel(x_ref, w1_ref, b1_ref, w2_ref, b2_ref, w3_ref, b3_ref, o_ref):
    # x_ref:         (TILE_R, dim_p)  current row tile (compute dtype)
    # w1_ref/w2_ref: (dim_p, dim_p)   pre-transposed, VMEM-resident weights
    # b1_ref/b2_ref: (1, dim_p)       f32 biases
    # w3_ref:        (1, dim_p)       f32 last-layer weight row
    # b3_ref:        (1,)             f32 scalar in SMEM
    # o_ref:         (1, 1, TILE_R)   lane-oriented output tile
    x = x_ref[...]
    cdt = x.dtype

    # Linear 1 + ReLU (MXU matmul, f32 accumulation).  If bit-level parity
    # with an f32 reference matters, add precision=lax.Precision.HIGHEST.
    h = jnp.dot(x, w1_ref[...], preferred_element_type=jnp.float32)
    h = jnp.maximum(h + b1_ref[...], 0.0)

    # Linear 2 + ReLU (cast back to compute dtype so the bf16 path stays bf16).
    h = jnp.dot(h.astype(cdt), w2_ref[...], preferred_element_type=jnp.float32)
    h = jnp.maximum(h + b2_ref[...], 0.0)

    # Linear 3 (dim -> 1) as a VPU multiply + cross-lane reduce; an N=1 MXU
    # matmul would waste 127/128 of the systolic array.
    out = jnp.sum(h * w3_ref[...], axis=-1) + b3_ref[0]        # (TILE_R,)
    o_ref[...] = out[None, None, :].astype(o_ref.dtype)


def single_discriminator(encoding, params, *, tile_rows=None):
    """Forward of SingleDiscriminator (GRL is identity in the forward pass).

    encoding: float array of shape (..., dim)
    params:   raw PyTorch-convention params (w1/b1/w2/b2/w3/b3) or the output
              of prepare_params() (preferred: transpose/cast/pad paid once).
    returns:  array of shape encoding.shape[:-1]
    """
    if "w1t" not in params:
        params = prepare_params(params)

    *lead, dim = encoding.shape
    assert dim == params["dim"], (dim, params["dim"])
    dim_p = params["dim_p"]
    cdt = params["compute_dtype"]

    rows = 1
    for d in lead:
        rows *= d
    rows = max(rows, 1)

    auto_tile, vmem_limit = _select_tiling(rows, dim_p, cdt.itemsize)
    if tile_rows is None:
        tile_rows = auto_tile
    else:
        tile_rows = min(_round_up(tile_rows, 8), _round_up(rows, 8))
    num_tiles = _cdiv(rows, tile_rows)
    padded_rows = num_tiles * tile_rows

    x2d = encoding.reshape(rows, dim).astype(cdt)
    if padded_rows != rows or dim_p != dim:
        # Single fused pad for the (rare) ragged tail rows + lane padding.
        x2d = jnp.pad(x2d, ((0, padded_rows - rows), (0, dim_p - dim)))

    const = lambda i: (0, 0)

    def build(single_buffered_weights):
        def const_spec(shape):
            if single_buffered_weights:
                # Constant index map -> second pipeline buffer is pure waste.
                return pl.BlockSpec(shape, const, pipeline_mode=pl.Buffered(1))
            return pl.BlockSpec(shape, const)

        return pl.pallas_call(
            _disc_kernel,
            out_shape=jax.ShapeDtypeStruct((num_tiles, 1, tile_rows),
                                           jnp.float32),
            grid=(num_tiles,),
            in_specs=[
                pl.BlockSpec((tile_rows, dim_p), lambda i: (i, 0)),  # x tile
                const_spec((dim_p, dim_p)),                          # W1^T
                const_spec((1, dim_p)),                              # b1
                const_spec((dim_p, dim_p)),                          # W2^T
                const_spec((1, dim_p)),                              # b2
                const_spec((1, dim_p)),                              # w3 row
                pl.BlockSpec(memory_space=pltpu.MemorySpace.SMEM),   # b3
            ],
            out_specs=pl.BlockSpec((1, 1, tile_rows), lambda i: (i, 0, 0)),
            compiler_params=pltpu.CompilerParams(
                dimension_semantics=("parallel",),
                vmem_limit_bytes=vmem_limit,
            ),
        )

    args = (x2d, params["w1t"], params["b1"], params["w2t"], params["b2"],
            params["w3"], params["b3"])
    try:
        # Preferred path: single-buffered resident weights.
        out_tiles = build(True)(*args)
    except Exception:
        # Fallback for jax builds without pipeline_mode support on top-level
        # BlockSpecs: default (double-buffered) weight blocks.
        out_tiles = build(False)(*args)

    flat = out_tiles.reshape(padded_rows)[:rows]
    return flat.reshape(lead) if lead else flat.reshape(())


def init_params(key, dim):
    """Deterministic synthetic parameters matching nn.Linear shapes."""
    ks = jax.random.split(key, 6)
    scale = 1.0 / jnp.sqrt(dim)
    return {
        "w1": jax.random.uniform(ks[0], (dim, dim), jnp.float32, -scale, scale),
        "b1": jax.random.uniform(ks[1], (dim,), jnp.float32, -scale, scale),
        "w2": jax.random.uniform(ks[2], (dim, dim), jnp.float32, -scale, scale),
        "b2": jax.random.uniform(ks[3], (dim,), jnp.float32, -scale, scale),
        "w3": jax.random.uniform(ks[4], (1, dim), jnp.float32, -scale, scale),
        "b3": jax.random.uniform(ks[5], (1,), jnp.float32, -scale, scale),
    }


def _reference(encoding, params):
    """Pure-JAX reference of the PyTorch forward."""
    x = encoding
    h = jnp.maximum(x @ params["w1"].T + params["b1"], 0.0)
    h = jnp.maximum(h @ params["w2"].T + params["b2"], 0.0)
    out = h @ params["w3"].T + params["b3"]
    return jnp.squeeze(out, -1)


if __name__ == "__main__":
    key = jax.random.PRNGKey(0)
    k_x, k_p = jax.random.split(key)

    batch, seq, dim = 2, 8, 32
    encoding = jax.random.normal(k_x, (batch, seq, dim), jnp.float32)
    params = init_params(k_p, dim)

    prepared = prepare_params(params)          # one-time weight prep
    out = single_discriminator(encoding, prepared)
    out = jax.block_until_ready(out)

    ref = _reference(encoding, params)
    assert out.shape == (batch, seq), out.shape
    max_err = float(jnp.max(jnp.abs(out - ref)))
    assert jnp.allclose(out, ref, atol=1e-4, rtol=1e-4), max_err
    print("KERNEL_OK")
</pallas_src>

<mosaic_0001>
module attributes {stable_mosaic.version = 11 : i64} {
  func.func @_disc_kernel(%arg0: i32, %arg1: memref<8x128xf32, #tpu.memory_space<vmem>>, %arg2: memref<128x128xf32, #tpu.memory_space<vmem>>, %arg3: memref<1x128xf32, #tpu.memory_space<vmem>>, %arg4: memref<128x128xf32, #tpu.memory_space<vmem>>, %arg5: memref<1x128xf32, #tpu.memory_space<vmem>>, %arg6: memref<1x128xf32, #tpu.memory_space<vmem>>, %arg7: memref<1xf32, #tpu.memory_space<smem>>, %arg8: memref<1x1x8xf32, #tpu.memory_space<vmem>>) attributes {dimension_semantics = [#tpu.dimension_semantics<parallel>], iteration_bounds = array<i64: 2>, scalar_prefetch = 0 : i64, scratch_operands = 0 : i64, tpu.core_type = #tpu.core_type<tc>, window_params = [{transform_indices = @transform_0, window_bounds = array<i64: 8, 128>}, {pipeline_mode = #tpu.pipeline_mode<synchronous>, transform_indices = @transform_1, window_bounds = array<i64: 128, 128>}, {pipeline_mode = #tpu.pipeline_mode<synchronous>, transform_indices = @transform_2, window_bounds = array<i64: 1, 128>}, {pipeline_mode = #tpu.pipeline_mode<synchronous>, transform_indices = @transform_3, window_bounds = array<i64: 128, 128>}, {pipeline_mode = #tpu.pipeline_mode<synchronous>, transform_indices = @transform_4, window_bounds = array<i64: 1, 128>}, {pipeline_mode = #tpu.pipeline_mode<synchronous>, transform_indices = @transform_5, window_bounds = array<i64: 1, 128>}, {transform_indices = @transform_6, window_bounds = array<i64: 1>}, {transform_indices = @transform_7, window_bounds = array<i64: 1, 1, 8>}]} {
    %c0 = arith.constant 0 : index
    %c0_0 = arith.constant 0 : index
    %0 = vector.load %arg1[%c0, %c0_0] : memref<8x128xf32, #tpu.memory_space<vmem>>, vector<8x128xf32>
    %c0_1 = arith.constant 0 : index
    %c0_2 = arith.constant 0 : index
    %1 = vector.load %arg2[%c0_1, %c0_2] : memref<128x128xf32, #tpu.memory_space<vmem>>, vector<128x128xf32>
    %cst = arith.constant dense<0.000000e+00> : vector<8x128xf32>
    %2 = tpu.matmul %0, %1, %cst {dimension_numbers = #tpu.dot_dimension_numbers<[1], [0], [0], [1], [0, 0, 1, 1], [], []>} : vector<8x128xf32>, vector<128x128xf32>, vector<8x128xf32> -> vector<8x128xf32>
    %c0_3 = arith.constant 0 : index
    %c0_4 = arith.constant 0 : index
    %3 = vector.load %arg3[%c0_3, %c0_4] : memref<1x128xf32, #tpu.memory_space<vmem>>, vector<1x128xf32>
    %4 = vector.broadcast %3 : vector<1x128xf32> to vector<8x128xf32>
    %5 = arith.addf %2, %4 : vector<8x128xf32>
    %cst_5 = arith.constant 0.000000e+00 : f32
    %6 = vector.broadcast %cst_5 : f32 to vector<8x128xf32>
    %7 = arith.maximumf %5, %6 : vector<8x128xf32>
    %c0_6 = arith.constant 0 : index
    %c0_7 = arith.constant 0 : index
    %8 = vector.load %arg4[%c0_6, %c0_7] : memref<128x128xf32, #tpu.memory_space<vmem>>, vector<128x128xf32>
    %cst_8 = arith.constant dense<0.000000e+00> : vector<8x128xf32>
    %9 = tpu.matmul %7, %8, %cst_8 {dimension_numbers = #tpu.dot_dimension_numbers<[1], [0], [0], [1], [0, 0, 1, 1], [], []>} : vector<8x128xf32>, vector<128x128xf32>, vector<8x128xf32> -> vector<8x128xf32>
    %c0_9 = arith.constant 0 : index
    %c0_10 = arith.constant 0 : index
    %10 = vector.load %arg5[%c0_9, %c0_10] : memref<1x128xf32, #tpu.memory_space<vmem>>, vector<1x128xf32>
    %11 = vector.broadcast %10 : vector<1x128xf32> to vector<8x128xf32>
    %12 = arith.addf %9, %11 : vector<8x128xf32>
    %cst_11 = arith.constant 0.000000e+00 : f32
    %13 = vector.broadcast %cst_11 : f32 to vector<8x128xf32>
    %14 = arith.maximumf %12, %13 : vector<8x128xf32>
    %c0_12 = arith.constant 0 : index
    %c0_13 = arith.constant 0 : index
    %15 = vector.load %arg6[%c0_12, %c0_13] : memref<1x128xf32, #tpu.memory_space<vmem>>, vector<1x128xf32>
    %16 = vector.broadcast %15 : vector<1x128xf32> to vector<8x128xf32>
    %17 = arith.mulf %14, %16 : vector<8x128xf32>
    %cst_14 = arith.constant dense<0.000000e+00> : vector<8xf32>
    %18 = vector.multi_reduction <add>, %17, %cst_14 [1] : vector<8x128xf32> to vector<8xf32>
    %c0_15 = arith.constant 0 : index
    %19 = memref.load %arg7[%c0_15] : memref<1xf32, #tpu.memory_space<smem>>
    %20 = vector.broadcast %19 : f32 to vector<8xf32>
    %21 = arith.addf %18, %20 : vector<8xf32>
    %22 = vector.shape_cast %21 : vector<8xf32> to vector<1x1x8xf32>
    %c0_16 = arith.constant 0 : index
    %c0_17 = arith.constant 0 : index
    %c0_18 = arith.constant 0 : index
    %23 = vector.load %arg8[%c0_16, %c0_17, %c0_18] : memref<1x1x8xf32, #tpu.memory_space<vmem>>, vector<1x1x8xf32>
    tpu.vector_store %arg8[%c0_16, %c0_17, %c0_18], %22 {strides = array<i32>} : memref<1x1x8xf32, #tpu.memory_space<vmem>>, vector<1x1x8xf32>,
    return
  }
  func.func @transform_0(%arg0: i32) -> (i32, i32) {
    %c0_i32 = arith.constant 0 : i32
    %c0_i32_0 = arith.constant 0 : i32
    return %arg0, %c0_i32 : i32, i32
  }
  func.func @transform_1(%arg0: i32) -> (i32, i32) {
    %c0_i32 = arith.constant 0 : i32
    %c0_i32_0 = arith.constant 0 : i32
    %c0_i32_1 = arith.constant 0 : i32
    return %c0_i32, %c0_i32_0 : i32, i32
  }
  func.func @transform_2(%arg0: i32) -> (i32, i32) {
    %c0_i32 = arith.constant 0 : i32
    %c0_i32_0 = arith.constant 0 : i32
    %c0_i32_1 = arith.constant 0 : i32
    return %c0_i32, %c0_i32_0 : i32, i32
  }
  func.func @transform_3(%arg0: i32) -> (i32, i32) {
    %c0_i32 = arith.constant 0 : i32
    %c0_i32_0 = arith.constant 0 : i32
    %c0_i32_1 = arith.constant 0 : i32
    return %c0_i32, %c0_i32_0 : i32, i32
  }
  func.func @transform_4(%arg0: i32) -> (i32, i32) {
    %c0_i32 = arith.constant 0 : i32
    %c0_i32_0 = arith.constant 0 : i32
    %c0_i32_1 = arith.constant 0 : i32
    return %c0_i32, %c0_i32_0 : i32, i32
  }
  func.func @transform_5(%arg0: i32) -> (i32, i32) {
    %c0_i32 = arith.constant 0 : i32
    %c0_i32_0 = arith.constant 0 : i32
    %c0_i32_1 = arith.constant 0 : i32
    return %c0_i32, %c0_i32_0 : i32, i32
  }
  func.func @transform_6(%arg0: i32) -> i32 {
    %c0_i32 = arith.constant 0 : i32
    %c0_i32_0 = arith.constant 0 : i32
    return %c0_i32 : i32
  }
  func.func @transform_7(%arg0: i32) -> (i32, i32, i32) {
    %c0_i32 = arith.constant 0 : i32
    %c0_i32_0 = arith.constant 0 : i32
    %c0_i32_1 = arith.constant 0 : i32
    return %arg0, %c0_i32, %c0_i32_0 : i32, i32, i32
  }
}

module attributes {stable_mosaic.version = 11 : i64} {
  func.func @_disc_kernel(%arg0: i32, %arg1: memref<8x128xf32, #tpu.memory_space<vmem>>, %arg2: memref<128x128xf32, #tpu.memory_space<vmem>>, %arg3: memref<1x128xf32, #tpu.memory_space<vmem>>, %arg4: memref<128x128xf32, #tpu.memory_space<vmem>>, %arg5: memref<1x128xf32, #tpu.memory_space<vmem>>, %arg6: memref<1x128xf32, #tpu.memory_space<vmem>>, %arg7: memref<1xf32, #tpu.memory_space<smem>>, %arg8: memref<1x1x8xf32, #tpu.memory_space<vmem>>) attributes {dimension_semantics = [#tpu.dimension_semantics<parallel>], iteration_bounds = array<i64: 2>, scalar_prefetch = 0 : i64, scratch_operands = 0 : i64, tpu.core_type = #tpu.core_type<tc>, window_params = [{transform_indices = @transform_0, window_bounds = array<i64: 8, 128>}, {pipeline_mode = #tpu.pipeline_mode<synchronous>, transform_indices = @transform_1, window_bounds = array<i64: 128, 128>}, {pipeline_mode = #tpu.pipeline_mode<synchronous>, transform_indices = @transform_2, window_bounds = array<i64: 1, 128>}, {pipeline_mode = #tpu.pipeline_mode<synchronous>, transform_indices = @transform_3, window_bounds = array<i64: 128, 128>}, {pipeline_mode = #tpu.pipeline_mode<synchronous>, transform_indices = @transform_4, window_bounds = array<i64: 1, 128>}, {pipeline_mode = #tpu.pipeline_mode<synchronous>, transform_indices = @transform_5, window_bounds = array<i64: 1, 128>}, {transform_indices = @transform_6, window_bounds = array<i64: 1>}, {transform_indices = @transform_7, window_bounds = array<i64: 1, 1, 8>}]} {
    %c0 = arith.constant 0 : index
    %c0_0 = arith.constant 0 : index
    %0 = vector.load %arg1[%c0, %c0_0] : memref<8x128xf32, #tpu.memory_space<vmem>>, vector<8x128xf32>
    %c0_1 = arith.constant 0 : index
    %c0_2 = arith.constant 0 : index
    %1 = vector.load %arg2[%c0_1, %c0_2] : memref<128x128xf32, #tpu.memory_space<vmem>>, vector<128x128xf32>
    %cst = arith.constant dense<0.000000e+00> : vector<8x128xf32>
    %2 = tpu.matmul %0, %1, %cst {dimension_numbers = #tpu.dot_dimension_numbers<[1], [0], [0], [1], [0, 0, 1, 1], [], []>} : vector<8x128xf32>, vector<128x128xf32>, vector<8x128xf32> -> vector<8x128xf32>
    %c0_3 = arith.constant 0 : index
    %c0_4 = arith.constant 0 : index
    %3 = vector.load %arg3[%c0_3, %c0_4] : memref<1x128xf32, #tpu.memory_space<vmem>>, vector<1x128xf32>
    %4 = vector.broadcast %3 : vector<1x128xf32> to vector<8x128xf32>
    %5 = arith.addf %2, %4 : vector<8x128xf32>
    %cst_5 = arith.constant 0.000000e+00 : f32
    %6 = vector.broadcast %cst_5 : f32 to vector<8x128xf32>
    %7 = arith.maximumf %5, %6 : vector<8x128xf32>
    %c0_6 = arith.constant 0 : index
    %c0_7 = arith.constant 0 : index
    %8 = vector.load %arg4[%c0_6, %c0_7] : memref<128x128xf32, #tpu.memory_space<vmem>>, vector<128x128xf32>
    %cst_8 = arith.constant dense<0.000000e+00> : vector<8x128xf32>
    %9 = tpu.matmul %7, %8, %cst_8 {dimension_numbers = #tpu.dot_dimension_numbers<[1], [0], [0], [1], [0, 0, 1, 1], [], []>} : vector<8x128xf32>, vector<128x128xf32>, vector<8x128xf32> -> vector<8x128xf32>
    %c0_9 = arith.constant 0 : index
    %c0_10 = arith.constant 0 : index
    %10 = vector.load %arg5[%c0_9, %c0_10] : memref<1x128xf32, #tpu.memory_space<vmem>>, vector<1x128xf32>
    %11 = vector.broadcast %10 : vector<1x128xf32> to vector<8x128xf32>
    %12 = arith.addf %9, %11 : vector<8x128xf32>
    %cst_11 = arith.constant 0.000000e+00 : f32
    %13 = vector.broadcast %cst_11 : f32 to vector<8x128xf32>
    %14 = arith.maximumf %12, %13 : vector<8x128xf32>
    %c0_12 = arith.constant 0 : index
    %c0_13 = arith.constant 0 : index
    %15 = vector.load %arg6[%c0_12, %c0_13] : memref<1x128xf32, #tpu.memory_space<vmem>>, vector<1x128xf32>
    %16 = vector.broadcast %15 : vector<1x128xf32> to vector<8x128xf32>
    %17 = arith.mulf %14, %16 : vector<8x128xf32>
    %cst_14 = arith.constant dense<0.000000e+00> : vector<8xf32>
    %18 = vector.multi_reduction <add>, %17, %cst_14 [1] : vector<8x128xf32> to vector<8xf32>
    %c0_15 = arith.constant 0 : index
    %19 = memref.load %arg7[%c0_15] : memref<1xf32, #tpu.memory_space<smem>>
    %20 = vector.broadcast %19 : f32 to vector<8xf32>
    %21 = arith.addf %18, %20 : vector<8xf32>
    %22 = vector.shape_cast %21 : vector<8xf32> to vector<1x1x8xf32>
    %c0_16 = arith.constant 0 : index
    %c0_17 = arith.constant 0 : index
    %c0_18 = arith.constant 0 : index
    %23 = vector.load %arg8[%c0_16, %c0_17, %c0_18] : memref<1x1x8xf32, #tpu.memory_space<vmem>>, vector<1x1x8xf32>
    tpu.vector_store %arg8[%c0_16, %c0_17, %c0_18], %22 {strides = array<i32>} : memref<1x1x8xf32, #tpu.memory_space<vmem>>, vector<1x1x8xf32>,
    return
  }
  func.func @transform_0(%arg0: i32) -> (i32, i32) {
    %c0_i32 = arith.constant 0 : i32
    %c0_i32_0 = arith.constant 0 : i32
    return %arg0, %c0_i32 : i32, i32
  }
  func.func @transform_1(%arg0: i32) -> (i32, i32) {
    %c0_i32 = arith.constant 0 : i32
    %c0_i32_0 = arith.constant 0 : i32
    %c0_i32_1 = arith.constant 0 : i32
    return %c0_i32, %c0_i32_0 : i32, i32
  }
  func.func @transform_2(%arg0: i32) -> (i32, i32) {
    %c0_i32 = arith.constant 0 : i32
    %c0_i32_0 = arith.constant 0 : i32
    %c0_i32_1 = arith.constant 0 : i32
    return %c0_i32, %c0_i32_0 : i32, i32
  }
  func.func @transform_3(%arg0: i32) -> (i32, i32) {
    %c0_i32 = arith.constant 0 : i32
    %c0_i32_0 = arith.constant 0 : i32
    %c0_i32_1 = arith.constant 0 : i32
    return %c0_i32, %c0_i32_0 : i32, i32
  }
  func.func @transform_4(%arg0: i32) -> (i32, i32) {
    %c0_i32 = arith.constant 0 : i32
    %c0_i32_0 = arith.constant 0 : i32
    %c0_i32_1 = arith.constant 0 : i32
    return %c0_i32, %c0_i32_0 : i32, i32
  }
  func.func @transform_5(%arg0: i32) -> (i32, i32) {
    %c0_i32 = arith.constant 0 : i32
    %c0_i32_0 = arith.constant 0 : i32
    %c0_i32_1 = arith.constant 0 : i32
    return %c0_i32, %c0_i32_0 : i32, i32
  }
  func.func @transform_6(%arg0: i32) -> i32 {
    %c0_i32 = arith.constant 0 : i32
    %c0_i32_0 = arith.constant 0 : i32
    return %c0_i32 : i32
  }
  func.func @transform_7(%arg0: i32) -> (i32, i32, i32) {
    %c0_i32 = arith.constant 0 : i32
    %c0_i32_0 = arith.constant 0 : i32
    %c0_i32_1 = arith.constant 0 : i32
    return %arg0, %c0_i32, %c0_i32_0 : i32, i32, i32
  }
}

</mosaic_0001>

<bundles_post_ra>
// kernel: tpu_custom_call.1
= control target key start
LH: loop header
LB: loop body
LE: loop exit
PB: predicated region body
PF: predicated region fallthrough
CT: control target
= control target key end

     0   :  { %s1342_s0 = inlined_call_operand.hbm [shape: f32[16,128], index: 0, kind: input, shape index: {}]   ;;  %s1343_s1 = inlined_call_operand.hbm [shape: f32[128,128], index: 1, kind: input, shape index: {}]   ;;  %s1344_s2 = inlined_call_operand.vmem [shape: f32[1,128], index: 2, kind: input, shape index: {}]   ;;  %s1345_s3 = inlined_call_operand.hbm [shape: f32[128,128], index: 3, kind: input, shape index: {}]   ;;  %s1346_s4 = inlined_call_operand.vmem [shape: f32[1,128], index: 4, kind: input, shape index: {}]   ;;  %s1347_s5 = inlined_call_operand.vmem [shape: f32[1,128], index: 5, kind: input, shape index: {}]   ;;  %s1348_s6 = inlined_call_operand.<no memory space> [shape: f32[1], index: 6, kind: input, shape index: {}]   ;;  %s1349_s7 = inlined_call_operand.hbm [shape: f32[2,1,8], index: 7, kind: output, shape index: {}]  }
   0x1   :  { %12 = sst [smem:[#allocation2]] %s1348_s6 }
   0x2   :  { %13 = vsyncpa [#allocation4], 0 }
   0x3   :  { %15 = vsyncpa [#allocation4 + $0x1], 0 }
   0x4   :  { %16 = vsyncpa [#allocation7], 0 }
   0x5   :  { %17 = vsyncpa [#allocation5], 0 }
   0x6   :  { %19 = vsyncpa [#allocation5 + $0x1], 0  ;;  %s1084_s26 = smov 0   ;;  %s1086_s27 = smov 0  }
   0x7   :  { %s1088_s28 = smov 0   ;;  %s1090_s29 = smov 0  }
   0x8 LB: > { %s1105_s6 = sadd.s32 4294967295, %s1030_s29   ;;  %s633_s30 = sadd.s32 4294967294, %s1030_s29   ;;  %s1030_s29 = sphi %s1090_s29, %s1369_s29   ;;  %s1026_s28 = sphi %s1088_s28, %s1368_s28   ;;  %s1022_s27 = sphi %s1086_s27, %s1367_s27   ;;  %s1018_s26 = sphi %s1084_s26, %s1366_s26  }
   0x9   : > { %p45_p0 = scmp.ne.s32.totalorder %s1022_s27, %s1018_s26  ;;  %p1350_p1 = scmp.eq.s32.totalorder %s1105_s6, 0 }
   0xa   : > { %p201_p3 = scmp.eq.s32.totalorder %s633_s30, 1  ;;  %p634_p5 = scmp.ge.s32.totalorder %s1030_s29, 1 }
   0xb   : > { %p1114_p4 = por %p1350_p1, %p45_p0  ;;  %p208_p7 = scmp.lt.s32.totalorder %s1030_s29, 3 }
   0xc   : > { %p1119_p6 = por %p201_p3, %p45_p0  ;;  %s1032_s11 = smov [#allocation6]  }
   0xd   : > { %s1353_s8 = scalar_select %p1114_p4, 1, 0 }
   0xe   : > { %s1354_s9 = scalar_select %p1119_p6, 1, 0 }
   0xf   : > { %p1124_p8 = pnand %p634_p5, %p208_p7  ;;  %s220_s12 = sshll.u32 %s1032_s11, 4  ;;  %s1128_s12 = int_to_ptr.vmem [resolvable:$true] %s220_s12 }
  0x10   : > { %s1033_s14 = smov [#allocation8]   ;;  %s874_s18 = scalar_lea.hbm %s1343_s1, 2048 }
  0x11   : > { %p814_p9 = pneg %p1124_p8  ;;  %s236_s15 = sshll.u32 %s1033_s14, 4  ;;  %s1139_s15 = int_to_ptr.vmem [resolvable:$true] %s236_s15 }
  0x12   : > { %p875_p12 = scmp.ne.s32.totalorder %s1343_s1, %s874_s18  ;;  %p881_p5 = scmp.lt.u32.totalorder %s874_s18, %s1343_s1 }
  0x13   : > { %p1135_p11 = pnand %p814_p9, %p1350_p1 }
  0x15   : > { %p876_p13 = pneg %p1135_p11 }
  0x17   : > { %p877_p0 = pnand %p876_p13, %p875_p12 }
  0x19   : > { %p878_p3 = pneg %p877_p0 }
  0x1b   : > { %p883_p7 = pnand %p881_p5, %p878_p3 }
  0x1d   : > { %886 = shalt.err (!%p883_p7)
}
  0x1e   : > { %s887_s23 = scalar_lea.vmem %s1128_s12, 2048  ;;  %p895_p2 = scmp.lt.s32.totalorder %s1128_s12, %s1128_s12 }
  0x1f   : > { %p888_p9 = scmp.ne.s32.totalorder %s1128_s12, %s887_s23  ;;  %p896_p12 = scmp.lt.s32.totalorder %s887_s23, %s887_s23 }
  0x21   : > { %p890_p10 = pnand %p888_p9, %p876_p13  ;;  %p897_p0 = por %p896_p12, %p895_p2 }
  0x23   : > { %p891_p1 = pneg %p890_p10 }
  0x25   : > { %p898_p6 = pnand %p897_p0, %p891_p1 }
  0x27   : > { %901 = shalt.err (!%p898_p6)
}
  0x28   : > { %s1034_s24 = smov 128   ;;  %s1035_s25 = smov 8  }
  0x29   : > { %817 = dma.hbm_to_vmem [thread:$0]  (!%p1135_p11), %s1343_s1, 2048, %s1128_s12, [#allocation7], %s1034_s24, %s1034_s24, %s1035_s25  }
  0x2a   : > { %s902_s17 = scalar_lea.hbm %s1345_s3, 2048 }
  0x2b   : > { %p903_p2 = scmp.ne.s32.totalorder %s1345_s3, %s902_s17  ;;  %p909_p10 = scmp.lt.u32.totalorder %s902_s17, %s1345_s3 }
  0x2d   : > { %p905_p1 = pnand %p903_p2, %p876_p13 }
  0x2f   : > { %p906_p6 = pneg %p905_p1 }
  0x31   : > { %p911_p3 = pnand %p909_p10, %p906_p6 }
  0x33   : > { %914 = shalt.err (!%p911_p3)
}
  0x34   : > { %s915_s12 = scalar_lea.vmem %s1139_s15, 2048  ;;  %p923_p12 = scmp.lt.s32.totalorder %s1139_s15, %s1139_s15 }
  0x35   : > { %p916_p5 = scmp.ne.s32.totalorder %s1139_s15, %s915_s12  ;;  %p924_p0 = scmp.lt.s32.totalorder %s915_s12, %s915_s12 }
  0x37   : > { %p918_p7 = pnand %p916_p5, %p876_p13  ;;  %p925_p2 = por %p924_p0, %p923_p12 }
  0x39   : > { %p919_p9 = pneg %p918_p7 }
  0x3b   : > { %p926_p1 = pnand %p925_p2, %p919_p9 }
  0x3d   : > { %929 = shalt.err (!%p926_p1)
}
  0x3e   : > { %820 = dma.hbm_to_vmem [thread:$0]  (!%p1135_p11), %s1345_s3, 2048, %s1139_s15, [#allocation7], %s1034_s24, %s1034_s24, %s1035_s25  }
  0x3f   : > { %s1194_s30 = sadd.s32 1, %s1030_s29   ;;  %s32_s13 = sadd.s32 1, %s1026_s28 }
  0x40   : > { %s29_s11 = ssub.s32 %s1030_s29, %s1194_s30  ;;  %p39_p13 = scmp.ne.s32.totalorder %s1026_s28, %s1022_s27 }
  0x41   : > { %p30_p6 = scmp.eq.s32.totalorder %s29_s11, 0  ;;  %p40_p10 = scmp.eq.s32.totalorder %s1030_s29, 0 }
  0x42   : > { %p1357_p3 = scmp.eq.s32.totalorder %s1105_s6, 1  ;;  %p831_p7 = scmp.lt.s32.totalorder %s1030_s29, 2 }
  0x43   : > { %s1210_s16 = scalar_select %p30_p6, %s1026_s28, %s32_s13  }
  0x44   : > { %p1204_p5 = por %p1357_p3, %p39_p13  ;;  %p41_p9 = por %p40_p10, %p39_p13 }
  0x45   : > { %s259_s17 = sand.u32 1, %s1026_s28   ;;  %s639_s15 = sshll.u32 %s1030_s29, 7 }
  0x46   : > { %s1358_s14 = scalar_select %p1204_p5, 1, 0 }
  0x47   : > { %s638_s18 = sshll.u32 %s259_s17, 3  ;;  %s1217_s19 = scalar_lea.hbm %s1342_s0, %s639_s15 }
  0x48   : > { %s263_s20 = scalar_lea.vmem [#allocation3], %s638_s18  ;;  %p1221_p11 = pnand %p831_p7, %p41_p9 }
  0x49   : > { %s270_s21 = sshll.u32 %s263_s20, 4  ;;  %s260_s22 = scalar_lea.sflag [#allocation4], %s259_s17  ;;  %s1219_s21 = int_to_ptr.vmem [resolvable:$true] %s270_s21 }
  0x4a   : > { %s930_s23 = scalar_lea.hbm %s1217_s19, 128  ;;  %p932_p0 = pneg %p1221_p11 }
  0x4b   : > { %p931_p12 = scmp.ne.s32.totalorder %s1217_s19, %s930_s23  ;;  %s935_s18 = scalar_lea.hbm %s1342_s0, 256 }
  0x4c   : > { %p936_p13 = scmp.lt.u32.totalorder %s1217_s19, %s1342_s0  ;;  %p937_p6 = scmp.lt.u32.totalorder %s935_s18, %s930_s23 }
  0x4d   : > { %p933_p2 = pnand %p932_p0, %p931_p12  ;;  %p939_p3 = scmp.lt.u32.totalorder %s930_s23, %s1217_s19 }
  0x4e   : > { %p938_p10 = por %p937_p6, %p936_p13 }
  0x4f   : > { %p934_p1 = pneg %p933_p2 }
  0x50   : > { %p940_p7 = por %p939_p3, %p938_p10 }
  0x52   : > { %p941_p9 = pnand %p940_p7, %p934_p1 }
  0x54   : > { %944 = shalt.err (!%p941_p9)
}
  0x55   : > { %s945_s17 = scalar_lea.vmem %s1219_s21, 128  ;;  %s1036_s25 = smov [#allocation3]  }
  0x56   : > { %p946_p12 = scmp.ne.s32.totalorder %s1219_s21, %s945_s17  ;;  %s950_s20 = sshll.u32 %s1036_s25, 4  ;;  %s951_s20 = int_to_ptr.vmem [resolvable:$false] %s950_s20 }
  0x57   : > { %s952_s13 = scalar_lea.vmem %s951_s20, 256  ;;  %p953_p4 = scmp.lt.s32.totalorder %s1219_s21, %s951_s20 }
  0x58   : > { %p948_p2 = pnand %p946_p12, %p932_p0  ;;  %p954_p13 = scmp.lt.s32.totalorder %s952_s13, %s945_s17 }
  0x5a   : > { %p949_p5 = pneg %p948_p2  ;;  %p955_p6 = por %p954_p13, %p953_p4 }
  0x5c   : > { %p956_p10 = pnand %p955_p6, %p949_p5 }
  0x5e   : > { %959 = shalt.err (!%p956_p10)
}
  0x5f   : > { %824 = dma.hbm_to_vmem [thread:$0]  (!%p1221_p11), %s1217_s19, 128, %s1219_s21, %s260_s22  }
  0x60   : > { %279 = sbr.rel (%p1124_p8) target bundleno = 735 (0x2df), region = 48  ;;  %s1253_s23 = sand.u32 (!%p1124_p8), 1, %s1022_s27  }
  0x61   : > { %s641_s11 = sshll.u32 (!%p1124_p8), %s1253_s23, 3  ;;  %s282_s18 = scalar_lea.sflag (!%p1124_p8), [#allocation4], %s1253_s23 }
  0x62   : > { %s1257_s15 = scalar_lea.vmem (!%p1124_p8), [#allocation3], %s641_s11  ;;  %p1360_p4 = scmp.ne.s32.totalorder (!%p1124_p8), %s1353_s8, 0 }
  0x67   : > { %1005 = dma.done.wait (%p1360_p4), %s282_s18, 128  }
  0x68   : > { %1007 = vsyncadd (%p1360_p4), %s282_s18, 4294967168  ;;  %p1361_p5 = scmp.eq.s32.totalorder %s1105_s6, 0 }
  0x6a   : > { %1009 = dma.done.wait (%p1361_p5), [#allocation7], 4096   ;;  %p1362_p8 = pmov %p1361_p5 }
  0x6b   : > { %v1037_v0 = vmov 0.0|0.0   ;;  %vm1038_vm0 = vmmov 0   ;;  %v1039_v1 = vmov 0.0   ;;  %v324_v2 = vld [vmem:[#allocation6] sm:$0xff]  ;;  %v325_v3 = vld [vmem:[#allocation6 + $0x8] sm:$0xff]  ;;  %v326_v4 = vld [vmem:[#allocation6 + $0x10] sm:$0xff]  ;;  %v526_v63 = vlaneseq }
  0x6c   : > { %1011 = vsyncadd (%p1362_p8), [#allocation7], 4294963200  ;;  %754 = vmatprep.subr.bf16.mxu0 %v1037_v0  ;;  %716 = vmatprep.mubr.msk.f32.mxu0 %vm1038_vm0, %v1039_v1  ;;  %v755_v5 = vpack.c.bf16 %v325_v3, %v324_v2  ;;  %v327_v6 = vld [vmem:[#allocation6 + $0x18] sm:$0xff]  ;;  %v328_v8 = vld [vmem:[#allocation6 + $0x20] sm:$0xff]  ;;  %s522_s24 = sld [smem:[#allocation2]]  ;;  %s647_s17 = sshll.u32 %s1105_s6, 4 }
  0x6d   : > { %778 = vmatprep.subr.bf16.mxu1 %v1037_v0  ;;  %751 = vmatprep.mubr.msk.f32.mxu1 %vm1038_vm0, %v1039_v1  ;;  %v758_v7 = vpack.c.bf16 %v327_v6, %v326_v4  ;;  %v329_v9 = vld [vmem:[#allocation6 + $0x28] sm:$0xff]  ;;  %v418_v10 = vld [vmem:[#allocation8] sm:$0xff]  ;;  %v420_v12 = vld [vmem:[#allocation8 + $0x10] sm:$0xff]  ;;  %v529_v1 = vshrl.u32 %v526_v63, 7  ;;  %s322_s25 = scalar_lea.vmem [#allocation9], %s1253_s23  ;;  %vm533_vm1 = vcmask 57344   ;;  %s1298_s18 = scalar_lea.hbm %s1349_s7, %s647_s17 }
  0x6e   : > { %756 = vmatpush3.bf16.msra.mxu0 %v755_v5  ;;  %v419_v11 = vld [vmem:[#allocation8 + $0x8] sm:$0xff]  ;;  %v421_v13 = vld [vmem:[#allocation8 + $0x18] sm:$0xff]  ;;  %v761_v14 = vpack.c.bf16 %v329_v9, %v328_v8  ;;  %v330_v16 = vld [vmem:[#allocation6 + $0x30] sm:$0xff]  ;;  %s548_s20 = sshll.u32 %s322_s25, 4  ;;  %p1363_p0 = scmp.ne.s32.totalorder %s1358_s14, 0  ;;  %s1300_s20 = int_to_ptr.vmem [resolvable:$true] %s548_s20 }
  0x6f   : > { %757 = vmatprep.subr.bf16.mxu0 %v1037_v0  ;;  %v779_v15 = vpack.c.bf16 %v419_v11, %v418_v10  ;;  %v331_v17 = vld [vmem:[#allocation6 + $0x38] sm:$0xff]  ;;  %v782_v18 = vpack.c.bf16 %v421_v13, %v420_v12  ;;  %v422_v19 = vld [vmem:[#allocation8 + $0x20] sm:$0xff]  ;;  %v423_v20 = vld [vmem:[#allocation8 + $0x28] sm:$0xff]  ;;  %s960_s8 = scalar_lea.vmem %s1300_s20, 16  ;;  %s1040_s6 = smov [#allocation9]  }
  0x70   : > { %v764_v21 = vpack.c.bf16 %v331_v17, %v330_v16  ;;  %v332_v22 = vld [vmem:[#allocation6 + $0x40] sm:$0xff]  ;;  %v333_v23 = vld [vmem:[#allocation6 + $0x48] sm:$0xff]  ;;  %v785_v24 = vpack.c.bf16 %v423_v20, %v422_v19  ;;  %v424_v25 = vld [vmem:[#allocation8 + $0x30] sm:$0xff]  ;;  %p961_p11 = scmp.ne.s32.totalorder %s1300_s20, %s960_s8  ;;  %s964_s10 = sshll.u32 %s1040_s6, 4  ;;  %s965_s10 = int_to_ptr.vmem [resolvable:$false] %s964_s10 }
  0x71   : > { %780 = vmatpush3.bf16.msra.mxu1 %v779_v15  ;;  %v425_v26 = vld [vmem:[#allocation8 + $0x38] sm:$0xff]  ;;  %v767_v27 = vpack.c.bf16 %v333_v23, %v332_v22  ;;  %v334_v28 = vld [vmem:[#allocation6 + $0x50] sm:$0xff]  ;;  %v426_v31 = vld [vmem:[#allocation8 + $0x40] sm:$0xff]  ;;  %s966_s19 = scalar_lea.vmem %s965_s10, 32  ;;  %p967_p7 = scmp.lt.s32.totalorder %s1300_s20, %s965_s10 }
  0x72   : > { %759 = vmatpush3.bf16.msra.mxu0 %v758_v7  ;;  %781 = vmatprep.subr.bf16.mxu1 %v1037_v0  ;;  %v335_v29 = vld [vmem:[#allocation6 + $0x58] sm:$0xff]  ;;  %v788_v30 = vpack.c.bf16 %v425_v26, %v424_v25  ;;  %v427_v32 = vld [vmem:[#allocation8 + $0x48] sm:$0xff]  ;;  %v336_v34 = vld [vmem:[#allocation6 + $0x60] sm:$0xff]  ;;  %v523_v2 = vstv %s522_s24  ;;  %p962_p1 = pnand %p961_p11, %p1363_p0  ;;  %p968_p9 = scmp.lt.s32.totalorder %s966_s19, %s960_s8 }
  0x73   : > { %760 = vmatprep.subr.bf16.mxu0 %v1037_v0  ;;  %v770_v33 = vpack.c.bf16 %v335_v29, %v334_v28  ;;  %v337_v35 = vld [vmem:[#allocation6 + $0x68] sm:$0xff]  ;;  %v791_v36 = vpack.c.bf16 %v427_v32, %v426_v31  ;;  %v428_v37 = vld [vmem:[#allocation8 + $0x50] sm:$0xff]  ;;  %v429_v38 = vld [vmem:[#allocation8 + $0x58] sm:$0xff] }
  0x74   : > { %v773_v39 = vpack.c.bf16 %v337_v35, %v336_v34  ;;  %v338_v40 = vld [vmem:[#allocation6 + $0x70] sm:$0xff]  ;;  %v339_v41 = vld [vmem:[#allocation6 + $0x78] sm:$0xff]  ;;  %v794_v42 = vpack.c.bf16 %v429_v38, %v428_v37  ;;  %v430_v43 = vld [vmem:[#allocation8 + $0x60] sm:$0xff]  ;;  %p963_p3 = pneg %p962_p1  ;;  %p969_p12 = por %p968_p9, %p967_p7 }
  0x75   : > { %783 = vmatpush3.bf16.msra.mxu1 %v782_v18  ;;  %v431_v44 = vld [vmem:[#allocation8 + $0x68] sm:$0xff]  ;;  %v776_v45 = vpack.c.bf16 %v339_v41, %v338_v40  ;;  %v323_v47 = vld [vmem:[%s1257_s15] sm:$0xff]  ;;  %s536_s15 = scalar_lea.sflag [#allocation5], %s1253_s23 }
  0x76   : > { %762 = vmatpush3.bf16.msra.mxu0 %v761_v14  ;;  %784 = vmatprep.subr.bf16.mxu1 %v1037_v0  ;;  %v797_v46 = vpack.c.bf16 %v431_v44, %v430_v43  ;;  %v432_v48 = vld [vmem:[#allocation8 + $0x70] sm:$0xff]  ;;  %v433_v49 = vld [vmem:[#allocation8 + $0x78] sm:$0xff]  ;;  %p970_p2 = pnand %p969_p12, %p963_p3 }
  0x77   : > { %763 = vmatprep.subr.bf16.mxu0 %v1037_v0  ;;  %v800_v50 = vpack.c.bf16 %v433_v49, %v432_v48  ;;  %v644_v51 = vld [vmem:[%s1344_s2] ss:$0 sm:$0xff] }
  0x78   : > { %v645_v56 = vld [vmem:[%s1346_s4] ss:$0 sm:$0xff] }
  0x79   : > { %786 = vmatpush3.bf16.msra.mxu1 %v785_v24  ;;  %v646_v60 = vld [vmem:[%s1347_s5] ss:$0 sm:$0xff] }
  0x7a   : > { %765 = vmatpush3.bf16.msra.mxu0 %v764_v21  ;;  %787 = vmatprep.subr.bf16.mxu1 %v1037_v0 }
  0x7b   : > { %766 = vmatprep.subr.bf16.mxu0 %v1037_v0 }
  0x7d   : > { %789 = vmatpush3.bf16.msra.mxu1 %v788_v30 }
  0x7e   : > { %768 = vmatpush3.bf16.msra.mxu0 %v767_v27  ;;  %790 = vmatprep.subr.bf16.mxu1 %v1037_v0 }
  0x7f   : > { %769 = vmatprep.subr.bf16.mxu0 %v1037_v0 }
  0x81   : > { %792 = vmatpush3.bf16.msra.mxu1 %v791_v36 }
  0x82   : > { %771 = vmatpush3.bf16.msra.mxu0 %v770_v33  ;;  %793 = vmatprep.subr.bf16.mxu1 %v1037_v0 }
  0x83   : > { %772 = vmatprep.subr.bf16.mxu0 %v1037_v0 }
  0x85   : > { %795 = vmatpush3.bf16.msra.mxu1 %v794_v42 }
  0x86   : > { %774 = vmatpush3.bf16.msra.mxu0 %v773_v39  ;;  %796 = vmatprep.subr.bf16.mxu1 %v1037_v0 }
  0x87   : > { %775 = vmatprep.subr.bf16.mxu0 %v1037_v0 }
  0x89   : > { %798 = vmatpush3.bf16.msra.mxu1 %v797_v46 }
  0x8a   : > { %777 = vmatpush3.bf16.msra.mxu0 %v776_v45  ;;  %799 = vmatprep.subr.bf16.mxu1 %v1037_v0  ;;  %v527_v0 = vand.u32 127, %v526_v63 }
  0x8c   : > { %v530_v3 = vsub.s32 %v527_v0, %v529_v1 }
  0x8d   : > { %717 = vmatmul.mubr.f32.vlgmr.msra.gmra.mrb[0].mxu0 %v323_v47  ;;  %801 = vmatpush3.bf16.msra.mxu1 %v800_v50 }
 0x160   : > { %v413_v52 = vpop.f32.mrb[0].mxu0 }
 0x161   : > { %v414_v53 = vadd.f32 %v644_v51, %v413_v52  ;;  %v718_v54 = vpop.f32.mrb[1].mxu0 }
 0x163   : > { %v417_v55 = vmax.f32 %v414_v53, 0.0 }
 0x165   : > { %752 = vmatmul.mubr.f32.vlgmr.msra.gmra.mrb[0].mxu1 %v417_v55 }
 0x238   : > { %v507_v57 = vpop.f32.mrb[0].mxu1 }
 0x239   : > { %v508_v58 = vadd.f32 %v645_v56, %v507_v57  ;;  %v753_v59 = vpop.f32.mrb[1].mxu1 }
 0x23b   : > { %v511_v61 = vmax.f32 %v508_v58, 0.0 }
 0x23d   : > { %v519_v62 = vmul.f32 %v646_v60, %v511_v61 }
 0x23f   : > { %520 = vadd.xlane.f32.xlu0 %v519_v62 }
 0x2cc   : > { %v521_v4 = vpop.xlane.xlu0 %520 }
 0x2cd   : > { %v524_v5 = vadd.f32 %v523_v2, %v521_v4 }
 0x2cf   : > { %v531_v6 = vrot.slane %v524_v5, %v530_v3 }
 0x2d1   : > { %534 = vst.msk [vmem:[%s322_s25] sm:$0x1] %vm533_vm1, %v531_v6 }
 0x2d2   : > { %973 = shalt.err (!%p970_p2)
}
 0x2d3   : > { %s974_s23 = scalar_lea.hbm %s1298_s18, 16  ;;  %s978_s22 = scalar_lea.hbm %s1349_s7, 32 }
 0x2d4   : > { %p975_p13 = scmp.ne.s32.totalorder %s1298_s18, %s974_s23  ;;  %p979_p4 = scmp.lt.u32.totalorder %s1298_s18, %s1349_s7 }
 0x2d5   : > { %p980_p5 = scmp.lt.u32.totalorder %s978_s22, %s974_s23  ;;  %p982_p11 = scmp.lt.u32.totalorder %s974_s23, %s1298_s18 }
 0x2d6   : > { %p976_p6 = pnand %p975_p13, %p1363_p0 }
 0x2d7   : > { %p981_p8 = por %p980_p5, %p979_p4 }
 0x2d8   : > { %p977_p10 = pneg %p976_p6 }
 0x2d9   : > { %p983_p1 = por %p982_p11, %p981_p8 }
 0x2db   : > { %p984_p3 = pnand %p983_p1, %p977_p10 }
 0x2dd   : > { %987 = shalt.err (!%p984_p3)
}
 0x2de   : > { %812 = dma.vmem_to_hbm [thread:$0]  (%p1363_p0), %s1300_s20, 16, %s1298_s18, %s536_s15  }
 0x2df PF: > { %s560_s25 = sand.u32 1, %s1018_s26   ;;  %p1364_p7 = scmp.ne.s32.totalorder %s1354_s9, 0 }
 0x2e0   : > { %p1365_p9 = scmp.ge.s32.totalorder %s1030_s29, 2  ;;  %s561_s13 = scalar_lea.sflag [#allocation5], %s560_s25 }
 0x2e2   : > { %p826_p12 = pnand %p1365_p9, %p1364_p7 }
 0x2e4   : > { %1013 = dma.done.wait (!%p826_p12), %s561_s13, 16  }
 0x2e5   : > { %1015 = vsyncadd (!%p826_p12), %s561_s13, 4294967280  ;;  %p22_p2 = scmp.ge.s32.totalorder %s1194_s30, 4   ;;  %s1366_s26 = smov %s1022_s27 }
 0x2e6   : > { %s1367_s27 = smov %s1026_s28  ;;  %s1368_s28 = smov %s1210_s16 }
 0x2e7   : > { %s1369_s29 = smov %s1194_s30  ;;  %24 = sbr.rel (!%p22_p2) target bundleno = 8 (0x8), region = 101 }
 0x2ee   :  { %565 = vsyncpa [#allocation4], 1 }
 0x2ef   :  { %567 = vsyncpa [#allocation4 + $0x1], 1 }
 0x2f0   :  { %568 = vsyncpa [#allocation7], 1 }
 0x2f1   :  { %569 = vsyncpa [#allocation5], 1 }
 0x2f2   :  { %571 = vsyncpa [#allocation5 + $0x1], 1 }

// kernel: tpu_custom_call.1
= control target key start
LH: loop header
LB: loop body
LE: loop exit
PB: predicated region body
PF: predicated region fallthrough
CT: control target
= control target key end

     0   :  { %s1342_s0 = inlined_call_operand.hbm [shape: f32[16,128], index: 0, kind: input, shape index: {}]   ;;  %s1343_s1 = inlined_call_operand.hbm [shape: f32[128,128], index: 1, kind: input, shape index: {}]   ;;  %s1344_s2 = inlined_call_operand.vmem [shape: f32[1,128], index: 2, kind: input, shape index: {}]   ;;  %s1345_s3 = inlined_call_operand.hbm [shape: f32[128,128], index: 3, kind: input, shape index: {}]   ;;  %s1346_s4 = inlined_call_operand.vmem [shape: f32[1,128], index: 4, kind: input, shape index: {}]   ;;  %s1347_s5 = inlined_call_operand.vmem [shape: f32[1,128], index: 5, kind: input, shape index: {}]   ;;  %s1348_s6 = inlined_call_operand.<no memory space> [shape: f32[1], index: 6, kind: input, shape index: {}]   ;;  %s1349_s7 = inlined_call_operand.hbm [shape: f32[2,1,8], index: 7, kind: output, shape index: {}]  }
   0x1   :  { %12 = sst [smem:[#allocation2]] %s1348_s6 }
   0x2   :  { %13 = vsyncpa [#allocation4], 0 }
   0x3   :  { %15 = vsyncpa [#allocation4 + $0x1], 0 }
   0x4   :  { %16 = vsyncpa [#allocation7], 0 }
   0x5   :  { %17 = vsyncpa [#allocation5], 0 }
   0x6   :  { %19 = vsyncpa [#allocation5 + $0x1], 0  ;;  %s1084_s26 = smov 0   ;;  %s1086_s27 = smov 0  }
   0x7   :  { %s1088_s28 = smov 0   ;;  %s1090_s29 = smov 0  }
   0x8 LB: > { %s1105_s6 = sadd.s32 4294967295, %s1030_s29   ;;  %s633_s30 = sadd.s32 4294967294, %s1030_s29   ;;  %s1030_s29 = sphi %s1090_s29, %s1369_s29   ;;  %s1026_s28 = sphi %s1088_s28, %s1368_s28   ;;  %s1022_s27 = sphi %s1086_s27, %s1367_s27   ;;  %s1018_s26 = sphi %s1084_s26, %s1366_s26  }
   0x9   : > { %p45_p0 = scmp.ne.s32.totalorder %s1022_s27, %s1018_s26  ;;  %p1350_p1 = scmp.eq.s32.totalorder %s1105_s6, 0 }
   0xa   : > { %p201_p3 = scmp.eq.s32.totalorder %s633_s30, 1  ;;  %p634_p5 = scmp.ge.s32.totalorder %s1030_s29, 1 }
   0xb   : > { %p1114_p4 = por %p1350_p1, %p45_p0  ;;  %p208_p7 = scmp.lt.s32.totalorder %s1030_s29, 3 }
   0xc   : > { %p1119_p6 = por %p201_p3, %p45_p0  ;;  %s1032_s11 = smov [#allocation6]  }
   0xd   : > { %s1353_s8 = scalar_select %p1114_p4, 1, 0 }
   0xe   : > { %s1354_s9 = scalar_select %p1119_p6, 1, 0 }
   0xf   : > { %p1124_p8 = pnand %p634_p5, %p208_p7  ;;  %s220_s12 = sshll.u32 %s1032_s11, 4  ;;  %s1128_s12 = int_to_ptr.vmem [resolvable:$true] %s220_s12 }
  0x10   : > { %s1033_s14 = smov [#allocation8]   ;;  %s874_s18 = scalar_lea.hbm %s1343_s1, 2048 }
  0x11   : > { %p814_p9 = pneg %p1124_p8  ;;  %s236_s15 = sshll.u32 %s1033_s14, 4  ;;  %s1139_s15 = int_to_ptr.vmem [resolvable:$true] %s236_s15 }
  0x12   : > { %p875_p12 = scmp.ne.s32.totalorder %s1343_s1, %s874_s18  ;;  %p881_p5 = scmp.lt.u32.totalorder %s874_s18, %s1343_s1 }
  0x13   : > { %p1135_p11 = pnand %p814_p9, %p1350_p1 }
  0x15   : > { %p876_p13 = pneg %p1135_p11 }
  0x17   : > { %p877_p0 = pnand %p876_p13, %p875_p12 }
  0x19   : > { %p878_p3 = pneg %p877_p0 }
  0x1b   : > { %p883_p7 = pnand %p881_p5, %p878_p3 }
  0x1d   : > { %886 = shalt.err (!%p883_p7)
}
  0x1e   : > { %s887_s23 = scalar_lea.vmem %s1128_s12, 2048  ;;  %p895_p2 = scmp.lt.s32.totalorder %s1128_s12, %s1128_s12 }
  0x1f   : > { %p888_p9 = scmp.ne.s32.totalorder %s1128_s12, %s887_s23  ;;  %p896_p12 = scmp.lt.s32.totalorder %s887_s23, %s887_s23 }
  0x21   : > { %p890_p10 = pnand %p888_p9, %p876_p13  ;;  %p897_p0 = por %p896_p12, %p895_p2 }
  0x23   : > { %p891_p1 = pneg %p890_p10 }
  0x25   : > { %p898_p6 = pnand %p897_p0, %p891_p1 }
  0x27   : > { %901 = shalt.err (!%p898_p6)
}
  0x28   : > { %s1034_s24 = smov 128   ;;  %s1035_s25 = smov 8  }
  0x29   : > { %817 = dma.hbm_to_vmem [thread:$0]  (!%p1135_p11), %s1343_s1, 2048, %s1128_s12, [#allocation7], %s1034_s24, %s1034_s24, %s1035_s25  }
  0x2a   : > { %s902_s17 = scalar_lea.hbm %s1345_s3, 2048 }
  0x2b   : > { %p903_p2 = scmp.ne.s32.totalorder %s1345_s3, %s902_s17  ;;  %p909_p10 = scmp.lt.u32.totalorder %s902_s17, %s1345_s3 }
  0x2d   : > { %p905_p1 = pnand %p903_p2, %p876_p13 }
  0x2f   : > { %p906_p6 = pneg %p905_p1 }
  0x31   : > { %p911_p3 = pnand %p909_p10, %p906_p6 }
  0x33   : > { %914 = shalt.err (!%p911_p3)
}
  0x34   : > { %s915_s12 = scalar_lea.vmem %s1139_s15, 2048  ;;  %p923_p12 = scmp.lt.s32.totalorder %s1139_s15, %s1139_s15 }
  0x35   : > { %p916_p5 = scmp.ne.s32.totalorder %s1139_s15, %s915_s12  ;;  %p924_p0 = scmp.lt.s32.totalorder %s915_s12, %s915_s12 }
  0x37   : > { %p918_p7 = pnand %p916_p5, %p876_p13  ;;  %p925_p2 = por %p924_p0, %p923_p12 }
  0x39   : > { %p919_p9 = pneg %p918_p7 }
  0x3b   : > { %p926_p1 = pnand %p925_p2, %p919_p9 }
  0x3d   : > { %929 = shalt.err (!%p926_p1)
}
  0x3e   : > { %820 = dma.hbm_to_vmem [thread:$0]  (!%p1135_p11), %s1345_s3, 2048, %s1139_s15, [#allocation7], %s1034_s24, %s1034_s24, %s1035_s25  }
  0x3f   : > { %s1194_s30 = sadd.s32 1, %s1030_s29   ;;  %s32_s13 = sadd.s32 1, %s1026_s28 }
  0x40   : > { %s29_s11 = ssub.s32 %s1030_s29, %s1194_s30  ;;  %p39_p13 = scmp.ne.s32.totalorder %s1026_s28, %s1022_s27 }
  0x41   : > { %p30_p6 = scmp.eq.s32.totalorder %s29_s11, 0  ;;  %p40_p10 = scmp.eq.s32.totalorder %s1030_s29, 0 }
  0x42   : > { %p1357_p3 = scmp.eq.s32.totalorder %s1105_s6, 1  ;;  %p831_p7 = scmp.lt.s32.totalorder %s1030_s29, 2 }
  0x43   : > { %s1210_s16 = scalar_select %p30_p6, %s1026_s28, %s32_s13  }
  0x44   : > { %p1204_p5 = por %p1357_p3, %p39_p13  ;;  %p41_p9 = por %p40_p10, %p39_p13 }
  0x45   : > { %s259_s17 = sand.u32 1, %s1026_s28   ;;  %s639_s15 = sshll.u32 %s1030_s29, 7 }
  0x46   : > { %s1358_s14 = scalar_select %p1204_p5, 1, 0 }
  0x47   : > { %s638_s18 = sshll.u32 %s259_s17, 3  ;;  %s1217_s19 = scalar_lea.hbm %s1342_s0, %s639_s15 }
  0x48   : > { %s263_s20 = scalar_lea.vmem [#allocation3], %s638_s18  ;;  %p1221_p11 = pnand %p831_p7, %p41_p9 }
  0x49   : > { %s270_s21 = sshll.u32 %s263_s20, 4  ;;  %s260_s22 = scalar_lea.sflag [#allocation4], %s259_s17  ;;  %s1219_s21 = int_to_ptr.vmem [resolvable:$true] %s270_s21 }
  0x4a   : > { %s930_s23 = scalar_lea.hbm %s1217_s19, 128  ;;  %p932_p0 = pneg %p1221_p11 }
  0x4b   : > { %p931_p12 = scmp.ne.s32.totalorder %s1217_s19, %s930_s23  ;;  %s935_s18 = scalar_lea.hbm %s1342_s0, 256 }
  0x4c   : > { %p936_p13 = scmp.lt.u32.totalorder %s1217_s19, %s1342_s0  ;;  %p937_p6 = scmp.lt.u32.totalorder %s935_s18, %s930_s23 }
  0x4d   : > { %p933_p2 = pnand %p932_p0, %p931_p12  ;;  %p939_p3 = scmp.lt.u32.totalorder %s930_s23, %s1217_s19 }
  0x4e   : > { %p938_p10 = por %p937_p6, %p936_p13 }
  0x4f   : > { %p934_p1 = pneg %p933_p2 }
  0x50   : > { %p940_p7 = por %p939_p3, %p938_p10 }
  0x52   : > { %p941_p9 = pnand %p940_p7, %p934_p1 }
  0x54   : > { %944 = shalt.err (!%p941_p9)
}
  0x55   : > { %s945_s17 = scalar_lea.vmem %s1219_s21, 128  ;;  %s1036_s25 = smov [#allocation3]  }
  0x56   : > { %p946_p12 = scmp.ne.s32.totalorder %s1219_s21, %s945_s17  ;;  %s950_s20 = sshll.u32 %s1036_s25, 4  ;;  %s951_s20 = int_to_ptr.vmem [resolvable:$false] %s950_s20 }
  0x57   : > { %s952_s13 = scalar_lea.vmem %s951_s20, 256  ;;  %p953_p4 = scmp.lt.s32.totalorder %s1219_s21, %s951_s20 }
  0x58   : > { %p948_p2 = pnand %p946_p12, %p932_p0  ;;  %p954_p13 = scmp.lt.s32.totalorder %s952_s13, %s945_s17 }
  0x5a   : > { %p949_p5 = pneg %p948_p2  ;;  %p955_p6 = por %p954_p13, %p953_p4 }
  0x5c   : > { %p956_p10 = pnand %p955_p6, %p949_p5 }
  0x5e   : > { %959 = shalt.err (!%p956_p10)
}
  0x5f   : > { %824 = dma.hbm_to_vmem [thread:$0]  (!%p1221_p11), %s1217_s19, 128, %s1219_s21, %s260_s22  }
  0x60   : > { %279 = sbr.rel (%p1124_p8) target bundleno = 735 (0x2df), region = 48  ;;  %s1253_s23 = sand.u32 (!%p1124_p8), 1, %s1022_s27  }
  0x61   : > { %s641_s11 = sshll.u32 (!%p1124_p8), %s1253_s23, 3  ;;  %s282_s18 = scalar_lea.sflag (!%p1124_p8), [#allocation4], %s1253_s23 }
  0x62   : > { %s1257_s15 = scalar_lea.vmem (!%p1124_p8), [#allocation3], %s641_s11  ;;  %p1360_p4 = scmp.ne.s32.totalorder (!%p1124_p8), %s1353_s8, 0 }
  0x67   : > { %1005 = dma.done.wait (%p1360_p4), %s282_s18, 128  }
  0x68   : > { %1007 = vsyncadd (%p1360_p4), %s282_s18, 4294967168  ;;  %p1361_p5 = scmp.eq.s32.totalorder %s1105_s6, 0 }
  0x6a   : > { %1009 = dma.done.wait (%p1361_p5), [#allocation7], 4096   ;;  %p1362_p8 = pmov %p1361_p5 }
  0x6b   : > { %v1037_v0 = vmov 0.0|0.0   ;;  %vm1038_vm0 = vmmov 0   ;;  %v1039_v1 = vmov 0.0   ;;  %v324_v2 = vld [vmem:[#allocation6] sm:$0xff]  ;;  %v325_v3 = vld [vmem:[#allocation6 + $0x8] sm:$0xff]  ;;  %v326_v4 = vld [vmem:[#allocation6 + $0x10] sm:$0xff]  ;;  %v526_v63 = vlaneseq }
  0x6c   : > { %1011 = vsyncadd (%p1362_p8), [#allocation7], 4294963200  ;;  %754 = vmatprep.subr.bf16.mxu0 %v1037_v0  ;;  %716 = vmatprep.mubr.msk.f32.mxu0 %vm1038_vm0, %v1039_v1  ;;  %v755_v5 = vpack.c.bf16 %v325_v3, %v324_v2  ;;  %v327_v6 = vld [vmem:[#allocation6 + $0x18] sm:$0xff]  ;;  %v328_v8 = vld [vmem:[#allocation6 + $0x20] sm:$0xff]  ;;  %s522_s24 = sld [smem:[#allocation2]]  ;;  %s647_s17 = sshll.u32 %s1105_s6, 4 }
  0x6d   : > { %778 = vmatprep.subr.bf16.mxu1 %v1037_v0  ;;  %751 = vmatprep.mubr.msk.f32.mxu1 %vm1038_vm0, %v1039_v1  ;;  %v758_v7 = vpack.c.bf16 %v327_v6, %v326_v4  ;;  %v329_v9 = vld [vmem:[#allocation6 + $0x28] sm:$0xff]  ;;  %v418_v10 = vld [vmem:[#allocation8] sm:$0xff]  ;;  %v420_v12 = vld [vmem:[#allocation8 + $0x10] sm:$0xff]  ;;  %v529_v1 = vshrl.u32 %v526_v63, 7  ;;  %s322_s25 = scalar_lea.vmem [#allocation9], %s1253_s23  ;;  %vm533_vm1 = vcmask 57344   ;;  %s1298_s18 = scalar_lea.hbm %s1349_s7, %s647_s17 }
  0x6e   : > { %756 = vmatpush3.bf16.msra.mxu0 %v755_v5  ;;  %v419_v11 = vld [vmem:[#allocation8 + $0x8] sm:$0xff]  ;;  %v421_v13 = vld [vmem:[#allocation8 + $0x18] sm:$0xff]  ;;  %v761_v14 = vpack.c.bf16 %v329_v9, %v328_v8  ;;  %v330_v16 = vld [vmem:[#allocation6 + $0x30] sm:$0xff]  ;;  %s548_s20 = sshll.u32 %s322_s25, 4  ;;  %p1363_p0 = scmp.ne.s32.totalorder %s1358_s14, 0  ;;  %s1300_s20 = int_to_ptr.vmem [resolvable:$true] %s548_s20 }
  0x6f   : > { %757 = vmatprep.subr.bf16.mxu0 %v1037_v0  ;;  %v779_v15 = vpack.c.bf16 %v419_v11, %v418_v10  ;;  %v331_v17 = vld [vmem:[#allocation6 + $0x38] sm:$0xff]  ;;  %v782_v18 = vpack.c.bf16 %v421_v13, %v420_v12  ;;  %v422_v19 = vld [vmem:[#allocation8 + $0x20] sm:$0xff]  ;;  %v423_v20 = vld [vmem:[#allocation8 + $0x28] sm:$0xff]  ;;  %s960_s8 = scalar_lea.vmem %s1300_s20, 16  ;;  %s1040_s6 = smov [#allocation9]  }
  0x70   : > { %v764_v21 = vpack.c.bf16 %v331_v17, %v330_v16  ;;  %v332_v22 = vld [vmem:[#allocation6 + $0x40] sm:$0xff]  ;;  %v333_v23 = vld [vmem:[#allocation6 + $0x48] sm:$0xff]  ;;  %v785_v24 = vpack.c.bf16 %v423_v20, %v422_v19  ;;  %v424_v25 = vld [vmem:[#allocation8 + $0x30] sm:$0xff]  ;;  %p961_p11 = scmp.ne.s32.totalorder %s1300_s20, %s960_s8  ;;  %s964_s10 = sshll.u32 %s1040_s6, 4  ;;  %s965_s10 = int_to_ptr.vmem [resolvable:$false] %s964_s10 }
  0x71   : > { %780 = vmatpush3.bf16.msra.mxu1 %v779_v15  ;;  %v425_v26 = vld [vmem:[#allocation8 + $0x38] sm:$0xff]  ;;  %v767_v27 = vpack.c.bf16 %v333_v23, %v332_v22  ;;  %v334_v28 = vld [vmem:[#allocation6 + $0x50] sm:$0xff]  ;;  %v426_v31 = vld [vmem:[#allocation8 + $0x40] sm:$0xff]  ;;  %s966_s19 = scalar_lea.vmem %s965_s10, 32  ;;  %p967_p7 = scmp.lt.s32.totalorder %s1300_s20, %s965_s10 }
  0x72   : > { %759 = vmatpush3.bf16.msra.mxu0 %v758_v7  ;;  %781 = vmatprep.subr.bf16.mxu1 %v1037_v0  ;;  %v335_v29 = vld [vmem:[#allocation6 + $0x58] sm:$0xff]  ;;  %v788_v30 = vpack.c.bf16 %v425_v26, %v424_v25  ;;  %v427_v32 = vld [vmem:[#allocation8 + $0x48] sm:$0xff]  ;;  %v336_v34 = vld [vmem:[#allocation6 + $0x60] sm:$0xff]  ;;  %v523_v2 = vstv %s522_s24  ;;  %p962_p1 = pnand %p961_p11, %p1363_p0  ;;  %p968_p9 = scmp.lt.s32.totalorder %s966_s19, %s960_s8 }
  0x73   : > { %760 = vmatprep.subr.bf16.mxu0 %v1037_v0  ;;  %v770_v33 = vpack.c.bf16 %v335_v29, %v334_v28  ;;  %v337_v35 = vld [vmem:[#allocation6 + $0x68] sm:$0xff]  ;;  %v791_v36 = vpack.c.bf16 %v427_v32, %v426_v31  ;;  %v428_v37 = vld [vmem:[#allocation8 + $0x50] sm:$0xff]  ;;  %v429_v38 = vld [vmem:[#allocation8 + $0x58] sm:$0xff] }
  0x74   : > { %v773_v39 = vpack.c.bf16 %v337_v35, %v336_v34  ;;  %v338_v40 = vld [vmem:[#allocation6 + $0x70] sm:$0xff]  ;;  %v339_v41 = vld [vmem:[#allocation6 + $0x78] sm:$0xff]  ;;  %v794_v42 = vpack.c.bf16 %v429_v38, %v428_v37  ;;  %v430_v43 = vld [vmem:[#allocation8 + $0x60] sm:$0xff]  ;;  %p963_p3 = pneg %p962_p1  ;;  %p969_p12 = por %p968_p9, %p967_p7 }
  0x75   : > { %783 = vmatpush3.bf16.msra.mxu1 %v782_v18  ;;  %v431_v44 = vld [vmem:[#allocation8 + $0x68] sm:$0xff]  ;;  %v776_v45 = vpack.c.bf16 %v339_v41, %v338_v40  ;;  %v323_v47 = vld [vmem:[%s1257_s15] sm:$0xff]  ;;  %s536_s15 = scalar_lea.sflag [#allocation5], %s1253_s23 }
  0x76   : > { %762 = vmatpush3.bf16.msra.mxu0 %v761_v14  ;;  %784 = vmatprep.subr.bf16.mxu1 %v1037_v0  ;;  %v797_v46 = vpack.c.bf16 %v431_v44, %v430_v43  ;;  %v432_v48 = vld [vmem:[#allocation8 + $0x70] sm:$0xff]  ;;  %v433_v49 = vld [vmem:[#allocation8 + $0x78] sm:$0xff]  ;;  %p970_p2 = pnand %p969_p12, %p963_p3 }
  0x77   : > { %763 = vmatprep.subr.bf16.mxu0 %v1037_v0  ;;  %v800_v50 = vpack.c.bf16 %v433_v49, %v432_v48  ;;  %v644_v51 = vld [vmem:[%s1344_s2] ss:$0 sm:$0xff] }
  0x78   : > { %v645_v56 = vld [vmem:[%s1346_s4] ss:$0 sm:$0xff] }
  0x79   : > { %786 = vmatpush3.bf16.msra.mxu1 %v785_v24  ;;  %v646_v60 = vld [vmem:[%s1347_s5] ss:$0 sm:$0xff] }
  0x7a   : > { %765 = vmatpush3.bf16.msra.mxu0 %v764_v21  ;;  %787 = vmatprep.subr.bf16.mxu1 %v1037_v0 }
  0x7b   : > { %766 = vmatprep.subr.bf16.mxu0 %v1037_v0 }
  0x7d   : > { %789 = vmatpush3.bf16.msra.mxu1 %v788_v30 }
  0x7e   : > { %768 = vmatpush3.bf16.msra.mxu0 %v767_v27  ;;  %790 = vmatprep.subr.bf16.mxu1 %v1037_v0 }
  0x7f   : > { %769 = vmatprep.subr.bf16.mxu0 %v1037_v0 }
  0x81   : > { %792 = vmatpush3.bf16.msra.mxu1 %v791_v36 }
  0x82   : > { %771 = vmatpush3.bf16.msra.mxu0 %v770_v33  ;;  %793 = vmatprep.subr.bf16.mxu1 %v1037_v0 }
  0x83   : > { %772 = vmatprep.subr.bf16.mxu0 %v1037_v0 }
  0x85   : > { %795 = vmatpush3.bf16.msra.mxu1 %v794_v42 }
  0x86   : > { %774 = vmatpush3.bf16.msra.mxu0 %v773_v39  ;;  %796 = vmatprep.subr.bf16.mxu1 %v1037_v0 }
  0x87   : > { %775 = vmatprep.subr.bf16.mxu0 %v1037_v0 }
  0x89   : > { %798 = vmatpush3.bf16.msra.mxu1 %v797_v46 }
  0x8a   : > { %777 = vmatpush3.bf16.msra.mxu0 %v776_v45  ;;  %799 = vmatprep.subr.bf16.mxu1 %v1037_v0  ;;  %v527_v0 = vand.u32 127, %v526_v63 }
  0x8c   : > { %v530_v3 = vsub.s32 %v527_v0, %v529_v1 }
  0x8d   : > { %717 = vmatmul.mubr.f32.vlgmr.msra.gmra.mrb[0].mxu0 %v323_v47  ;;  %801 = vmatpush3.bf16.msra.mxu1 %v800_v50 }
 0x160   : > { %v413_v52 = vpop.f32.mrb[0].mxu0 }
 0x161   : > { %v414_v53 = vadd.f32 %v644_v51, %v413_v52  ;;  %v718_v54 = vpop.f32.mrb[1].mxu0 }
 0x163   : > { %v417_v55 = vmax.f32 %v414_v53, 0.0 }
 0x165   : > { %752 = vmatmul.mubr.f32.vlgmr.msra.gmra.mrb[0].mxu1 %v417_v55 }
 0x238   : > { %v507_v57 = vpop.f32.mrb[0].mxu1 }
 0x239   : > { %v508_v58 = vadd.f32 %v645_v56, %v507_v57  ;;  %v753_v59 = vpop.f32.mrb[1].mxu1 }
 0x23b   : > { %v511_v61 = vmax.f32 %v508_v58, 0.0 }
 0x23d   : > { %v519_v62 = vmul.f32 %v646_v60, %v511_v61 }
 0x23f   : > { %520 = vadd.xlane.f32.xlu0 %v519_v62 }
 0x2cc   : > { %v521_v4 = vpop.xlane.xlu0 %520 }
 0x2cd   : > { %v524_v5 = vadd.f32 %v523_v2, %v521_v4 }
 0x2cf   : > { %v531_v6 = vrot.slane %v524_v5, %v530_v3 }
 0x2d1   : > { %534 = vst.msk [vmem:[%s322_s25] sm:$0x1] %vm533_vm1, %v531_v6 }
 0x2d2   : > { %973 = shalt.err (!%p970_p2)
}
 0x2d3   : > { %s974_s23 = scalar_lea.hbm %s1298_s18, 16  ;;  %s978_s22 = scalar_lea.hbm %s1349_s7, 32 }
 0x2d4   : > { %p975_p13 = scmp.ne.s32.totalorder %s1298_s18, %s974_s23  ;;  %p979_p4 = scmp.lt.u32.totalorder %s1298_s18, %s1349_s7 }
 0x2d5   : > { %p980_p5 = scmp.lt.u32.totalorder %s978_s22, %s974_s23  ;;  %p982_p11 = scmp.lt.u32.totalorder %s974_s23, %s1298_s18 }
 0x2d6   : > { %p976_p6 = pnand %p975_p13, %p1363_p0 }
 0x2d7   : > { %p981_p8 = por %p980_p5, %p979_p4 }
 0x2d8   : > { %p977_p10 = pneg %p976_p6 }
 0x2d9   : > { %p983_p1 = por %p982_p11, %p981_p8 }
 0x2db   : > { %p984_p3 = pnand %p983_p1, %p977_p10 }
 0x2dd   : > { %987 = shalt.err (!%p984_p3)
}
 0x2de   : > { %812 = dma.vmem_to_hbm [thread:$0]  (%p1363_p0), %s1300_s20, 16, %s1298_s18, %s536_s15  }
 0x2df PF: > { %s560_s25 = sand.u32 1, %s1018_s26   ;;  %p1364_p7 = scmp.ne.s32.totalorder %s1354_s9, 0 }
 0x2e0   : > { %p1365_p9 = scmp.ge.s32.totalorder %s1030_s29, 2  ;;  %s561_s13 = scalar_lea.sflag [#allocation5], %s560_s25 }
 0x2e2   : > { %p826_p12 = pnand %p1365_p9, %p1364_p7 }
 0x2e4   : > { %1013 = dma.done.wait (!%p826_p12), %s561_s13, 16  }
 0x2e5   : > { %1015 = vsyncadd (!%p826_p12), %s561_s13, 4294967280  ;;  %p22_p2 = scmp.ge.s32.totalorder %s1194_s30, 4   ;;  %s1366_s26 = smov %s1022_s27 }
 0x2e6   : > { %s1367_s27 = smov %s1026_s28  ;;  %s1368_s28 = smov %s1210_s16 }
 0x2e7   : > { %s1369_s29 = smov %s1194_s30  ;;  %24 = sbr.rel (!%p22_p2) target bundleno = 8 (0x8), region = 101 }
 0x2ee   :  { %565 = vsyncpa [#allocation4], 1 }
 0x2ef   :  { %567 = vsyncpa [#allocation4 + $0x1], 1 }
 0x2f0   :  { %568 = vsyncpa [#allocation7], 1 }
 0x2f1   :  { %569 = vsyncpa [#allocation5], 1 }
 0x2f2   :  { %571 = vsyncpa [#allocation5 + $0x1], 1 }

</bundles_post_ra>
